<compile_context>
chip_gen: v6e
topology: v6e:2x2x1
jax: 0.10.0
libtpu: 0.0.40
codegen_flags: <defaults>
</compile_context>

<pallas_src>
import jax
import jax.numpy as jnp
from jax.experimental import pallas as pl
from jax.experimental.pallas import tpu as pltpu


def _policy_kernel(x_ref, w1_ref, b1_ref, wh_ref, bh_ref, out_ref):
    x = x_ref[...]                         # (2, TB)   batch on lanes
    w1 = w1_ref[...]                       # (128, 2)

    # First layer (K = 2) as VPU broadcast multiply-adds; MXU stays free.
    h = w1[:, 0:1] * x[0:1, :] + w1[:, 1:2] * x[1:2, :] + b1_ref[...]
    h = jnp.maximum(h, 0.0)                # (128, TB)

    # Fused head: row 0 = action-logit difference, row 1 = state value.
    heads = jnp.dot(wh_ref[...], h, preferred_element_type=jnp.float32)
    heads = heads + bh_ref[...]            # (2, TB)

    z = heads[0:1, :]                      # logit(class1) - logit(class0)
    v = heads[1:2, :]                      # state value

    # Numerically-stable 2-class softmax == sigmoid of the logit difference.
    ez = jnp.exp(-jnp.abs(z))              # in (0, 1]; one EUP exp per element
    inv = 1.0 / (1.0 + ez)
    p_hi = inv                             # prob of the more likely class
    p_lo = ez * inv                        # prob of the less likely class
    pos = z >= 0.0
    p1 = jnp.where(pos, p_hi, p_lo)
    p0 = jnp.where(pos, p_lo, p_hi)

    # Single lane-dense block store per tile.
    out_ref[...] = jnp.concatenate([p0, p1, v], axis=0)   # (3, TB)


def _choose_tiling(B):
    """Return (TB, num_tiles): TB % 128 == 0, TB <= 8192, num_tiles * TB >= B,
    and num_tiles even whenever > 1 (balances v7x's two TensorCores)."""
    TB_MAX = 8192
    if B <= 4096:
        n = 1                               # tiny/medium batch: one tile
    else:
        n = max(2, -(-B // TB_MAX))         # cdiv at the max tile size
        if n % 2:
            n += 1                          # even tile count for 2-TC sharding
    tb = -(-B // n)                         # per-tile batch
    tb = max(128, -(-tb // 128) * 128)      # round up to the lane width
    return tb, n


def policy_forward(x, params):
    """x: (B, 2) float32.  Returns (action_prob (B, 2), state_values (B, 1))."""
    w1, b1, wa, ba, wv, bv = params
    B = x.shape[0]

    TB, n_tiles = _choose_tiling(B)
    Bp = TB * n_tiles

    # Host-side packing (layout plumbing, single fused pad+transpose):
    xt = jnp.pad(x, ((0, Bp - B), (0, 0))).T          # (2, Bp)  batch on lanes
    w1t = w1.T                                        # (128, 2)
    b1t = b1.T                                        # (128, 1)
    # Fused head: softmax difference folded in on the host.
    wht = jnp.concatenate(
        [(wa[:, 1:2] - wa[:, 0:1]).T, wv.T], axis=0)  # (2, 128)
    bht = jnp.concatenate(
        [ba[:, 1:2] - ba[:, 0:1], bv], axis=0)        # (2, 1)

    cost = pl.CostEstimate(
        flops=2 * Bp * 2 * 128 + 2 * Bp * 128 * 2,
        transcendentals=Bp,
        bytes_accessed=4 * (Bp * 2 + Bp * 3 + 2 * 128 + 128 + 2 * 128 + 2),
    )

    out = pl.pallas_call(
        _policy_kernel,
        out_shape=jax.ShapeDtypeStruct((3, Bp), jnp.float32),
        grid=(n_tiles,),
        in_specs=[
            pl.BlockSpec((2, TB), lambda i: (0, i)),     # x tile (batch on lanes)
            pl.BlockSpec((128, 2), lambda i: (0, 0)),    # w1 (VMEM-resident)
            pl.BlockSpec((128, 1), lambda i: (0, 0)),    # b1 (VMEM-resident)
            pl.BlockSpec((2, 128), lambda i: (0, 0)),    # fused head weight (resident)
            pl.BlockSpec((2, 1), lambda i: (0, 0)),      # fused head bias (resident)
        ],
        out_specs=pl.BlockSpec((3, TB), lambda i: (0, i)),
        compiler_params=pltpu.CompilerParams(
            dimension_semantics=("parallel",),           # v7x: shard tiles over 2 TCs
            vmem_limit_bytes=32 * 1024 * 1024,           # actual need < 9 MiB at TB=8192
        ),
        cost_estimate=cost,
    )(xt, w1t, b1t, wht, bht)

    # One output transpose of the packed slab, then cheap slices.
    out_t = out[:, :B].T                                 # (B, 3)
    probs = out_t[:, 0:2]                                # (B, 2)
    vals = out_t[:, 2:3]                                 # (B, 1)
    return probs, vals


def init_params(key):
    """Deterministic synthetic parameters matching the PyTorch module shapes."""
    k1, k2, k3, k4, k5, k6 = jax.random.split(key, 6)
    # nn.Linear(2, 128) stored transposed as (in, out)
    w1 = jax.random.uniform(k1, (2, 128), jnp.float32, -0.5, 0.5)
    b1 = jax.random.uniform(k2, (1, 128), jnp.float32, -0.5, 0.5)
    # nn.Linear(128, 2)
    wa = jax.random.uniform(k3, (128, 2), jnp.float32, -0.1, 0.1)
    ba = jax.random.uniform(k4, (1, 2), jnp.float32, -0.1, 0.1)
    # nn.Linear(128, 1)
    wv = jax.random.uniform(k5, (128, 1), jnp.float32, -0.1, 0.1)
    bv = jax.random.uniform(k6, (1, 1), jnp.float32, -0.1, 0.1)
    return (w1, b1, wa, ba, wv, bv)


def _reference(x, params):
    w1, b1, wa, ba, wv, bv = params
    h = jnp.maximum(x @ w1 + b1, 0.0)
    logits = h @ wa + ba
    probs = jax.nn.softmax(logits, axis=-1)
    vals = h @ wv + bv
    return probs, vals


if __name__ == "__main__":
    key = jax.random.PRNGKey(0)
    kx, kx2, kp = jax.random.split(key, 3)
    params = init_params(kp)

    # Small batch (single padded 128-wide tile).
    B = 8                                  # batch of states, each state is (x, y)
    x = jax.random.normal(kx, (B, 2), dtype=jnp.float32)
    probs, vals = policy_forward(x, params)
    jax.block_until_ready((probs, vals))

    ref_probs, ref_vals = _reference(x, params)
    assert probs.shape == (B, 2) and vals.shape == (B, 1)
    assert jnp.allclose(probs, ref_probs, atol=1e-5, rtol=1e-5)
    assert jnp.allclose(vals, ref_vals, atol=1e-5, rtol=1e-5)
    assert jnp.allclose(jnp.sum(probs, axis=-1), 1.0, atol=1e-5)

    # Non-multiple-of-128 batch: exercises the padded single-tile path (TB=384).
    B2 = 383
    x2 = jax.random.normal(kx2, (B2, 2), dtype=jnp.float32)
    probs2, vals2 = policy_forward(x2, params)
    jax.block_until_ready((probs2, vals2))
    ref_probs2, ref_vals2 = _reference(x2, params)
    assert jnp.allclose(probs2, ref_probs2, atol=1e-5, rtol=1e-5)
    assert jnp.allclose(vals2, ref_vals2, atol=1e-5, rtol=1e-5)

    # Larger batch exercising the multi-tile (even grid) path.
    B3 = 5000
    x3 = jax.random.normal(jax.random.PRNGKey(3), (B3, 2), dtype=jnp.float32)
    probs3, vals3 = policy_forward(x3, params)
    jax.block_until_ready((probs3, vals3))
    ref_probs3, ref_vals3 = _reference(x3, params)
    assert jnp.allclose(probs3, ref_probs3, atol=1e-5, rtol=1e-5)
    assert jnp.allclose(vals3, ref_vals3, atol=1e-5, rtol=1e-5)

    print("KERNEL_OK")
</pallas_src>

<mosaic_0001>
module attributes {stable_mosaic.version = 11 : i64} {
  func.func @_policy_kernel(%arg0: i32, %arg1: memref<2x128xf32, #tpu.memory_space<vmem>>, %arg2: memref<128x2xf32, #tpu.memory_space<vmem>>, %arg3: memref<128x1xf32, #tpu.memory_space<vmem>>, %arg4: memref<2x128xf32, #tpu.memory_space<vmem>>, %arg5: memref<2x1xf32, #tpu.memory_space<vmem>>, %arg6: memref<3x128xf32, #tpu.memory_space<vmem>>) attributes {dimension_semantics = [#tpu.dimension_semantics<parallel>], iteration_bounds = array<i64: 1>, scalar_prefetch = 0 : i64, scratch_operands = 0 : i64, tpu.core_type = #tpu.core_type<tc>, window_params = [{transform_indices = @transform_0, window_bounds = array<i64: 2, 128>}, {pipeline_mode = #tpu.pipeline_mode<synchronous>, transform_indices = @transform_1, window_bounds = array<i64: 128, 2>}, {pipeline_mode = #tpu.pipeline_mode<synchronous>, transform_indices = @transform_2, window_bounds = array<i64: 128, 1>}, {pipeline_mode = #tpu.pipeline_mode<synchronous>, transform_indices = @transform_3, window_bounds = array<i64: 2, 128>}, {pipeline_mode = #tpu.pipeline_mode<synchronous>, transform_indices = @transform_4, window_bounds = array<i64: 2, 1>}, {transform_indices = @transform_5, window_bounds = array<i64: 3, 128>}]} {
    %c0 = arith.constant 0 : index
    %c0_0 = arith.constant 0 : index
    %0 = vector.load %arg1[%c0, %c0_0] : memref<2x128xf32, #tpu.memory_space<vmem>>, vector<2x128xf32>
    %c0_1 = arith.constant 0 : index
    %c0_2 = arith.constant 0 : index
    %1 = vector.load %arg2[%c0_1, %c0_2] : memref<128x2xf32, #tpu.memory_space<vmem>>, vector<128x2xf32>
    %2 = vector.extract_strided_slice %1 {offsets = [0, 0], sizes = [128, 1], strides = [1, 1]} : vector<128x2xf32> to vector<128x1xf32>
    %3 = vector.extract_strided_slice %0 {offsets = [0, 0], sizes = [1, 128], strides = [1, 1]} : vector<2x128xf32> to vector<1x128xf32>
    %4 = vector.broadcast %2 : vector<128x1xf32> to vector<128x128xf32>
    %5 = vector.broadcast %3 : vector<1x128xf32> to vector<128x128xf32>
    %6 = arith.mulf %4, %5 : vector<128x128xf32>
    %7 = vector.extract_strided_slice %1 {offsets = [0, 1], sizes = [128, 1], strides = [1, 1]} : vector<128x2xf32> to vector<128x1xf32>
    %8 = vector.extract_strided_slice %0 {offsets = [1, 0], sizes = [1, 128], strides = [1, 1]} : vector<2x128xf32> to vector<1x128xf32>
    %9 = vector.broadcast %7 : vector<128x1xf32> to vector<128x128xf32>
    %10 = vector.broadcast %8 : vector<1x128xf32> to vector<128x128xf32>
    %11 = arith.mulf %9, %10 : vector<128x128xf32>
    %12 = arith.addf %6, %11 : vector<128x128xf32>
    %c0_3 = arith.constant 0 : index
    %c0_4 = arith.constant 0 : index
    %13 = vector.load %arg3[%c0_3, %c0_4] : memref<128x1xf32, #tpu.memory_space<vmem>>, vector<128x1xf32>
    %14 = vector.broadcast %13 : vector<128x1xf32> to vector<128x128xf32>
    %15 = arith.addf %12, %14 : vector<128x128xf32>
    %cst = arith.constant 0.000000e+00 : f32
    %16 = vector.broadcast %cst : f32 to vector<128x128xf32>
    %17 = arith.maximumf %15, %16 : vector<128x128xf32>
    %c0_5 = arith.constant 0 : index
    %c0_6 = arith.constant 0 : index
    %18 = vector.load %arg4[%c0_5, %c0_6] : memref<2x128xf32, #tpu.memory_space<vmem>>, vector<2x128xf32>
    %cst_7 = arith.constant dense<0.000000e+00> : vector<2x128xf32>
    %19 = tpu.matmul %18, %17, %cst_7 {dimension_numbers = #tpu.dot_dimension_numbers<[1], [0], [0], [1], [0, 0, 1, 1], [], []>} : vector<2x128xf32>, vector<128x128xf32>, vector<2x128xf32> -> vector<2x128xf32>
    %c0_8 = arith.constant 0 : index
    %c0_9 = arith.constant 0 : index
    %20 = vector.load %arg5[%c0_8, %c0_9] : memref<2x1xf32, #tpu.memory_space<vmem>>, vector<2x1xf32>
    %21 = vector.broadcast %20 : vector<2x1xf32> to vector<2x128xf32>
    %22 = arith.addf %19, %21 : vector<2x128xf32>
    %23 = vector.extract_strided_slice %22 {offsets = [0, 0], sizes = [1, 128], strides = [1, 1]} : vector<2x128xf32> to vector<1x128xf32>
    %24 = vector.extract_strided_slice %22 {offsets = [1, 0], sizes = [1, 128], strides = [1, 1]} : vector<2x128xf32> to vector<1x128xf32>
    %25 = math.absf %23 : vector<1x128xf32>
    %cst_10 = arith.constant 0.000000e+00 : f32
    %26 = vector.broadcast %cst_10 : f32 to vector<1x128xf32>
    %27 = arith.subf %26, %25 : vector<1x128xf32>
    %28 = math.exp %27 : vector<1x128xf32>
    %cst_11 = arith.constant 1.000000e+00 : f32
    %29 = vector.broadcast %cst_11 : f32 to vector<1x128xf32>
    %30 = arith.addf %29, %28 : vector<1x128xf32>
    %cst_12 = arith.constant 1.000000e+00 : f32
    %31 = vector.broadcast %cst_12 : f32 to vector<1x128xf32>
    %32 = arith.divf %31, %30 : vector<1x128xf32>
    %33 = arith.mulf %28, %32 : vector<1x128xf32>
    %cst_13 = arith.constant 0.000000e+00 : f32
    %34 = vector.broadcast %cst_13 : f32 to vector<1x128xf32>
    %35 = arith.cmpf oge, %23, %34 : vector<1x128xf32>
    %36 = arith.select %35, %32, %33 : vector<1x128xi1>, vector<1x128xf32>
    %37 = arith.select %35, %33, %32 : vector<1x128xi1>, vector<1x128xf32>
    %38 = tpu.concatenate %37, %36, %24 in 0 : vector<1x128xf32>, vector<1x128xf32>, vector<1x128xf32> -> vector<3x128xf32>
    %c0_14 = arith.constant 0 : index
    %c0_15 = arith.constant 0 : index
    %39 = vector.load %arg6[%c0_14, %c0_15] : memref<3x128xf32, #tpu.memory_space<vmem>>, vector<3x128xf32>
    tpu.vector_store %arg6[%c0_14, %c0_15], %38 {strides = array<i32>} : memref<3x128xf32, #tpu.memory_space<vmem>>, vector<3x128xf32>,
    return
  }
  func.func @transform_0(%arg0: i32) -> (i32, i32) {
    %c0_i32 = arith.constant 0 : i32
    %c0_i32_0 = arith.constant 0 : i32
    return %c0_i32, %arg0 : i32, i32
  }
  func.func @transform_1(%arg0: i32) -> (i32, i32) {
    %c0_i32 = arith.constant 0 : i32
    %c0_i32_0 = arith.constant 0 : i32
    %c0_i32_1 = arith.constant 0 : i32
    return %c0_i32, %c0_i32_0 : i32, i32
  }
  func.func @transform_2(%arg0: i32) -> (i32, i32) {
    %c0_i32 = arith.constant 0 : i32
    %c0_i32_0 = arith.constant 0 : i32
    %c0_i32_1 = arith.constant 0 : i32
    return %c0_i32, %c0_i32_0 : i32, i32
  }
  func.func @transform_3(%arg0: i32) -> (i32, i32) {
    %c0_i32 = arith.constant 0 : i32
    %c0_i32_0 = arith.constant 0 : i32
    %c0_i32_1 = arith.constant 0 : i32
    return %c0_i32, %c0_i32_0 : i32, i32
  }
  func.func @transform_4(%arg0: i32) -> (i32, i32) {
    %c0_i32 = arith.constant 0 : i32
    %c0_i32_0 = arith.constant 0 : i32
    %c0_i32_1 = arith.constant 0 : i32
    return %c0_i32, %c0_i32_0 : i32, i32
  }
  func.func @transform_5(%arg0: i32) -> (i32, i32) {
    %c0_i32 = arith.constant 0 : i32
    %c0_i32_0 = arith.constant 0 : i32
    return %c0_i32, %arg0 : i32, i32
  }
}

</mosaic_0001>

<bundles_post_ra>
// kernel: tpu_custom_call.1
= control target key start
LH: loop header
LB: loop body
LE: loop exit
PB: predicated region body
PF: predicated region fallthrough
CT: control target
= control target key end

     0   :  { %v581_v2 = vmov 1   ;;  %v582_v3 = vmov 0   ;;  %s812_s0 = inlined_call_operand.vmem [shape: f32[2,128], index: 0, kind: input, shape index: {}]   ;;  %s813_s1 = inlined_call_operand.vmem [shape: f32[128,2], index: 1, kind: input, shape index: {}]   ;;  %s814_s2 = inlined_call_operand.vmem [shape: f32[128,1], index: 2, kind: input, shape index: {}]   ;;  %s815_s3 = inlined_call_operand.vmem [shape: f32[2,128], index: 3, kind: input, shape index: {}]   ;;  %s816_s4 = inlined_call_operand.vmem [shape: f32[2,1], index: 4, kind: input, shape index: {}]   ;;  %s817_s5 = inlined_call_operand.hbm [shape: f32[3,128], index: 5, kind: output, shape index: {}]  }
   0x1   :  { %v37_v0 = vld [vmem:[%s813_s1 + $0x78] sm:$0xff]  ;;  %v36_v1 = vld [vmem:[%s813_s1 + $0x70] sm:$0xff]  ;;  %536 = vset.pattern.permute.xlu0 %v581_v2  ;;  %537 = vset.pattern.permute.xlu1 %v582_v3  ;;  %v35_v4 = vld [vmem:[%s813_s1 + $0x68] sm:$0xff] }
   0x2   :  { %199 = vperm.xlu0 %536, %v37_v0   ;;  %110 = vperm.xlu1 %537, %v36_v1   ;;  %v32_v5 = vld [vmem:[%s813_s1 + $0x50] sm:$0xff]  ;;  %v31_v6 = vld [vmem:[%s813_s1 + $0x48] sm:$0xff] }
   0x6   :  { %538 = vset.pattern.permute.xlu1 %v581_v2  ;;  %191 = vperm.xlu0 %536, %v35_v4  }
   0x7   :  { %195 = vperm.xlu1 %538, %v36_v1  }
   0xa   :  { %179 = vperm.xlu0 %536, %v32_v5  }
   0xb   :  { %539 = vset.pattern.permute.xlu1 %v582_v3 }
   0xc   :  { %10 = vsyncpa [#allocation3], 0  ;;  %105 = vperm.xlu1 %539, %v35_v4   ;;  %v253_v7 = vld [vmem:[%s814_s2 + $0x78] sm:$0xff]  ;;  %v28_v8 = vld [vmem:[%s813_s1 + $0x30] sm:$0xff]  ;;  %v583_v16 = vmov 0.0   ;;  %vm584_vm0 = vmmov 0   ;;  %v118_v45 = vlaneseq }
   0xd   :  { %v34_v9 = vld [vmem:[%s813_s1 + $0x60] sm:$0xff]  ;;  %v27_v10 = vld [vmem:[%s813_s1 + $0x28] sm:$0xff]  ;;  %v252_v11 = vld [vmem:[%s814_s2 + $0x70] sm:$0xff]  ;;  %496 = vmatprep.subr.mxu0 %v583_v16  ;;  %528 = vmatprep.mubr.msk.f32.mxu0 %vm584_vm0, %v583_v16  ;;  %vm460_vm2 = vcmask 1040384   ;;  %vm462_vm3 = vcmask 1041408  }
   0xe   :  { %175 = vperm.xlu0 %536, %v31_v6   ;;  %v654_v12 = vld [vmem:[%s813_s1 + $0x10] sm:$0xff]  ;;  %v23_v13 = vld [vmem:[%s813_s1 + $0x8] sm:$0xff]  ;;  %v33_v14 = vld [vmem:[%s813_s1 + $0x58] sm:$0xff]  ;;  %v119_v48 = vshrl.u32 %v118_v45, 7 }
   0xf   :  { %v250_v15 = vld [vmem:[%s814_s2 + $0x60] sm:$0xff]  ;;  %v251_v17 = vld [vmem:[%s814_s2 + $0x68] sm:$0xff]  ;;  %v249_v18 = vld [vmem:[%s814_s2 + $0x58] sm:$0xff] }
  0x10   :  { %331 = vperm.xlu1 %539, %v253_v7   ;;  %v30_v19 = vld [vmem:[%s813_s1 + $0x40] sm:$0xff]  ;;  %v29_v20 = vld [vmem:[%s813_s1 + $0x38] sm:$0xff]  ;;  %v248_v21 = vld [vmem:[%s814_s2 + $0x50] sm:$0xff]  ;;  %v204_v49 = vsub.s32 1, %v119_v48  ;;  %v120_v52 = vsub.s32 0, %v119_v48 }
  0x11   :  { %v247_v22 = vld [vmem:[%s814_s2 + $0x48] sm:$0xff]  ;;  %v26_v23 = vld [vmem:[%s813_s1 + $0x20] sm:$0xff]  ;;  %v25_v24 = vld [vmem:[%s813_s1 + $0x18] sm:$0xff] }
  0x12   :  { %163 = vperm.xlu0 %536, %v28_v8   ;;  %v243_v25 = vld [vmem:[%s814_s2 + $0x28] sm:$0xff]  ;;  %v246_v26 = vld [vmem:[%s814_s2 + $0x40] sm:$0xff]  ;;  %v245_v29 = vld [vmem:[%s814_s2 + $0x38] sm:$0xff] }
  0x13   :  { %v22_v27 = vld [vmem:[%s813_s1] sm:$0xff]  ;;  %v239_v28 = vld [vmem:[%s814_s2 + $0x8] sm:$0xff]  ;;  %v244_v31 = vld [vmem:[%s814_s2 + $0x30] sm:$0xff] }
  0x14   :  { %540 = vset.pattern.permute.xlu1 %v581_v2  ;;  %v367_v30 = vld [vmem:[%s816_s4] sm:$0x3]  ;;  %v241_v33 = vld [vmem:[%s814_s2 + $0x18] sm:$0xff]  ;;  %v240_v34 = vld [vmem:[%s814_s2 + $0x10] sm:$0xff] }
  0x15   :  { %187 = vperm.xlu1 %540, %v34_v9   ;;  %v242_v32 = vld [vmem:[%s814_s2 + $0x20] sm:$0xff] }
  0x16   :  { %159 = vperm.xlu0 %536, %v27_v10   ;;  %v238_v35 = vld [vmem:[%s814_s2] sm:$0xff] }
  0x17   :  { %v21_v53 = vld [vmem:[%s812_s0] sm:$0x3] }
  0x18   :  { %v749_v54 = vrot.slane %v21_v53, %v204_v49  ;;  %v753_v57 = vrot.slane %v21_v53, %v120_v52 }
  0x19   :  { %541 = vset.pattern.permute.xlu1 %v582_v3 }
  0x1a   :  { %326 = vperm.xlu1 %541, %v252_v11   ;;  %147 = vperm.xlu0 %536, %v654_v12  }
  0x1e   :  { %542 = vset.pattern.permute.xlu1 %v581_v2  ;;  %143 = vperm.xlu0 %536, %v23_v13  }
  0x1f   :  { %183 = vperm.xlu1 %542, %v33_v14  }
  0x22   :  { %552 = vset.pattern.permute.xlu0 %v582_v3 }
  0x23   :  { %543 = vset.pattern.permute.xlu1 %v582_v3  ;;  %115 = vperm.xlu0 %552, %v37_v0  }
  0x24   :  { %90 = vperm.xlu1 %543, %v32_v5  }
  0x27   :  { %100 = vperm.xlu0 %552, %v34_v9  }
  0x28   :  { %316 = vperm.xlu1 %543, %v250_v15  }
  0x2b   :  { %95 = vperm.xlu0 %552, %v33_v14  }
  0x2c   :  { %85 = vperm.xlu1 %543, %v31_v6  }
  0x2f   :  { %321 = vperm.xlu0 %552, %v251_v17  }
  0x30   :  { %311 = vperm.xlu1 %543, %v249_v18  }
  0x33   :  { %80 = vperm.xlu0 %552, %v30_v19  }
  0x34   :  { %544 = vset.pattern.permute.xlu1 %v581_v2 }
  0x35   :  { %171 = vperm.xlu1 %544, %v30_v19  }
  0x37   :  { %75 = vperm.xlu0 %552, %v29_v20  }
  0x39   :  { %545 = vset.pattern.permute.xlu1 %v582_v3 }
  0x3a   :  { %306 = vperm.xlu1 %545, %v248_v21  }
  0x3b   :  { %301 = vperm.xlu0 %552, %v247_v22  }
  0x3e   :  { %546 = vset.pattern.permute.xlu1 %v581_v2 }
  0x3f   :  { %167 = vperm.xlu1 %546, %v29_v20   ;;  %60 = vperm.xlu0 %552, %v26_v23  }
  0x43   :  { %547 = vset.pattern.permute.xlu1 %v582_v3  ;;  %55 = vperm.xlu0 %552, %v25_v24  }
  0x44   :  { %70 = vperm.xlu1 %547, %v28_v8  }
  0x47   :  { %281 = vperm.xlu0 %552, %v243_v25  }
  0x48   :  { %296 = vperm.xlu1 %547, %v246_v26  }
  0x4b   :  { %40 = vperm.xlu0 %552, %v22_v27  }
  0x4c   :  { %65 = vperm.xlu1 %547, %v27_v10  }
  0x4f   :  { %261 = vperm.xlu0 %552, %v239_v28  }
  0x50   :  { %291 = vperm.xlu1 %547, %v245_v29  }
  0x53   :  { %370 = vperm.xlu0 %552, %v367_v30  }
  0x54   :  { %548 = vset.pattern.permute.xlu1 %v581_v2 }
  0x55   :  { %155 = vperm.xlu1 %548, %v26_v23  }
  0x59   :  { %549 = vset.pattern.permute.xlu1 %v582_v3 }
  0x5a   :  { %286 = vperm.xlu1 %549, %v244_v31  }
  0x5e   :  { %550 = vset.pattern.permute.xlu1 %v581_v2 }
  0x5f   :  { %151 = vperm.xlu1 %550, %v25_v24  }
  0x63   :  { %551 = vset.pattern.permute.xlu1 %v582_v3 }
  0x64   :  { %50 = vperm.xlu1 %551, %v654_v12  }
  0x68   :  { %276 = vperm.xlu1 %551, %v242_v32  }
  0x6c   :  { %45 = vperm.xlu1 %551, %v23_v13  }
  0x70   :  { %271 = vperm.xlu1 %551, %v241_v33  }
  0x74   :  { %553 = vset.pattern.permute.xlu1 %v581_v2 }
  0x75   :  { %139 = vperm.xlu1 %553, %v22_v27  }
  0x79   :  { %554 = vset.pattern.permute.xlu1 %v582_v3 }
  0x7a   :  { %266 = vperm.xlu1 %554, %v240_v34  }
  0x7d   :  { %v111_v36 = vpop.permute.xlu1 %110  ;;  %v200_v37 = vpop.permute.xlu0 %199 }
  0x7e   :  { %256 = vperm.xlu1 %554, %v238_v35   ;;  %v221_v58 = vmul.f32 %v749_v54, %v200_v37  ;;  %v136_v61 = vmul.f32 %v753_v57, %v111_v36 }
  0x81   :  { %v192_v38 = vpop.permute.xlu0 %191 }
  0x82   :  { %v196_v39 = vpop.permute.xlu1 %195  ;;  %v219_v7 = vmul.f32 %v749_v54, %v192_v38 }
  0x83   :  { %v220_v59 = vmul.f32 %v749_v54, %v196_v39 }
  0x85   :  { %v180_v40 = vpop.permute.xlu0 %179  ;;  %v236_v0 = vadd.f32 %v220_v59, %v136_v61 }
  0x86   :  { %v216_v28 = vmul.f32 %v749_v54, %v180_v40 }
  0x87   :  { %v106_v41 = vpop.permute.xlu1 %105 }
  0x88   :  { %v135_v8 = vmul.f32 %v753_v57, %v106_v41 }
  0x89   :  { %v176_v42 = vpop.permute.xlu0 %175 }
  0x8a   :  { %v235_v18 = vadd.f32 %v219_v7, %v135_v8  ;;  %v215_v31 = vmul.f32 %v749_v54, %v176_v42 }
  0x8b   :  { %v332_v43 = vpop.permute.xlu1 %331 }
  0x8d   :  { %v740_v44 = vpop.permute.xlu0 %163 }
  0x90   :  { %v188_v46 = vpop.permute.xlu1 %187 }
  0x91   :  { %v742_v47 = vpop.permute.xlu0 %159  ;;  %v218_v9 = vmul.f32 %v749_v54, %v188_v46 }
  0x95   :  { %v327_v50 = vpop.permute.xlu1 %326  ;;  %v744_v51 = vpop.permute.xlu0 %147 }
  0x96   :  { %v348_v3 = vadd.f32 %v327_v50, %v236_v0 }
  0x98   :  { %v364_v12 = vmax.f32 %v348_v3, 0.0  ;;  %v211_v3 = vmul.f32 %v749_v54, %v742_v47 }
  0x99   :  { %v751_v55 = vpop.permute.xlu0 %143 }
  0x9a   :  { %v184_v56 = vpop.permute.xlu1 %183 }
  0x9b   :  { %v217_v13 = vmul.f32 %v749_v54, %v184_v56 }
  0x9e   :  { %v116_v60 = vpop.permute.xlu0 %115 }
  0x9f   :  { %v137_v62 = vmul.f32 %v753_v57, %v116_v60  ;;  %v91_v63 = vpop.permute.xlu1 %90 }
  0xa0   :  { %v132_v29 = vmul.f32 %v753_v57, %v91_v63 }
  0xa1   :  { %v237_v1 = vadd.f32 %v221_v58, %v137_v62 }
  0xa2   :  { %v101_v2 = vpop.permute.xlu0 %100  ;;  %v232_v35 = vadd.f32 %v216_v28, %v132_v29 }
  0xa3   :  { %v134_v4 = vmul.f32 %v753_v57, %v101_v2  ;;  %v317_v5 = vpop.permute.xlu1 %316  ;;  %v349_v6 = vadd.f32 %v332_v43, %v237_v1 }
  0xa5   :  { %v365_v10 = vmax.f32 %v349_v6, 0.0  ;;  %v234_v14 = vadd.f32 %v218_v9, %v134_v4  ;;  %v212_v6 = vmul.f32 %v749_v54, %v740_v44 }
  0xa6   :  { %v96_v11 = vpop.permute.xlu0 %95 }
  0xa7   :  { %v133_v15 = vmul.f32 %v753_v57, %v96_v11  ;;  %v86_v17 = vpop.permute.xlu1 %85  ;;  %497 = vmatpush3.msra.mxu0 %v365_v10  ;;  %v346_v21 = vadd.f32 %v317_v5, %v234_v14 }
  0xa8   :  { %498 = vmatprep.subr.mxu0 %v583_v16  ;;  %v131_v32 = vmul.f32 %v753_v57, %v86_v17 }
  0xa9   :  { %499 = vmatpush3.msra.mxu0 %v364_v12  ;;  %v233_v19 = vadd.f32 %v217_v13, %v133_v15  ;;  %v362_v27 = vmax.f32 %v346_v21, 0.0 }
  0xaa   :  { %v322_v20 = vpop.permute.xlu0 %321  ;;  %500 = vmatprep.subr.mxu0 %v583_v16  ;;  %v231_v37 = vadd.f32 %v215_v31, %v131_v32  ;;  %v207_v31 = vmul.f32 %v749_v54, %v751_v55 }
  0xab   :  { %v347_v22 = vadd.f32 %v322_v20, %v235_v18  ;;  %v312_v23 = vpop.permute.xlu1 %311 }
  0xac   :  { %v345_v25 = vadd.f32 %v312_v23, %v233_v19 }
  0xad   :  { %v363_v24 = vmax.f32 %v347_v22, 0.0 }
  0xae   :  { %v81_v26 = vpop.permute.xlu0 %80  ;;  %v361_v33 = vmax.f32 %v345_v25, 0.0 }
  0xaf   :  { %501 = vmatpush3.msra.mxu0 %v363_v24  ;;  %v130_v42 = vmul.f32 %v753_v57, %v81_v26 }
  0xb0   :  { %v172_v30 = vpop.permute.xlu1 %171  ;;  %502 = vmatprep.subr.mxu0 %v583_v16 }
  0xb1   :  { %503 = vmatpush3.msra.mxu0 %v362_v27  ;;  %v214_v46 = vmul.f32 %v749_v54, %v172_v30 }
  0xb2   :  { %v76_v34 = vpop.permute.xlu0 %75  ;;  %504 = vmatprep.subr.mxu0 %v583_v16 }
  0xb3   :  { %505 = vmatpush3.msra.mxu0 %v361_v33  ;;  %v230_v49 = vadd.f32 %v214_v46, %v130_v42  ;;  %v129_v53 = vmul.f32 %v753_v57, %v76_v34  ;;  %v208_v34 = vmul.f32 %v749_v54, %v744_v51  ;;  %v366_v51 = vld [vmem:[%s815_s3] sm:$0x3]  ;;  %s585_s3 = smov [#allocation2]  }
  0xb4   :  { %506 = vmatprep.subr.mxu0 %v583_v16  ;;  %s471_s9 = sshll.u32 %s585_s3, 4  ;;  %s472_s9 = int_to_ptr.vmem [resolvable:$true] %s471_s9 }
  0xb5   :  { %v307_v36 = vpop.permute.xlu1 %306  ;;  %s559_s10 = scalar_lea.vmem %s472_s9, 64  ;;  %p564_p1 = scmp.lt.s32.totalorder %s472_s9, %s472_s9 }
  0xb6   :  { %v344_v38 = vadd.f32 %v307_v36, %v232_v35  ;;  %v302_v39 = vpop.permute.xlu0 %301  ;;  %p560_p0 = scmp.ne.s32.totalorder %s472_s9, %s559_s10  ;;  %p565_p2 = scmp.lt.s32.totalorder %s559_s10, %s559_s10 }
  0xb7   :  { %v343_v40 = vadd.f32 %v302_v39, %v231_v37 }
  0xb8   :  { %v360_v41 = vmax.f32 %v344_v38, 0.0  ;;  %p566_p3 = por %p565_p2, %p564_p1 }
  0xb9   :  { %v359_v43 = vmax.f32 %v343_v40, 0.0 }
  0xba   :  { %v168_v45 = vpop.permute.xlu1 %167  ;;  %507 = vmatpush3.msra.mxu0 %v360_v41  ;;  %v61_v60 = vpop.permute.xlu0 %60  ;;  %p567_p4 = pnand %p566_p3, %p560_p0 }
  0xbb   :  { %508 = vmatprep.subr.mxu0 %v583_v16  ;;  %v213_v56 = vmul.f32 %v749_v54, %v168_v45  ;;  %v126_v44 = vmul.f32 %v753_v57, %v61_v60 }
  0xbc   :  { %509 = vmatpush3.msra.mxu0 %v359_v43 }
  0xbd   :  { %510 = vmatprep.subr.mxu0 %v583_v16  ;;  %v229_v61 = vadd.f32 %v213_v56, %v129_v53 }
  0xbe   :  { %v56_v2 = vpop.permute.xlu0 %55 }
  0xbf   :  { %v71_v48 = vpop.permute.xlu1 %70  ;;  %v125_v24 = vmul.f32 %v753_v57, %v56_v2 }
  0xc0   :  { %v128_v4 = vmul.f32 %v753_v57, %v71_v48 }
  0xc2   :  { %v228_v8 = vadd.f32 %v212_v6, %v128_v4  ;;  %v282_v9 = vpop.permute.xlu0 %281 }
  0xc3   :  { %v297_v50 = vpop.permute.xlu1 %296 }
  0xc4   :  { %v342_v52 = vadd.f32 %v297_v50, %v230_v49 }
  0xc6   :  { %v358_v58 = vmax.f32 %v342_v52, 0.0  ;;  %v41_v30 = vpop.permute.xlu0 %40 }
  0xc7   :  { %v66_v59 = vpop.permute.xlu1 %65  ;;  %v122_v40 = vmul.f32 %v753_v57, %v41_v30 }
  0xc8   :  { %511 = vmatpush3.msra.mxu0 %v358_v58  ;;  %v127_v0 = vmul.f32 %v753_v57, %v66_v59 }
  0xc9   :  { %512 = vmatprep.subr.mxu0 %v583_v16 }
  0xca   :  { %v227_v7 = vadd.f32 %v211_v3, %v127_v0  ;;  %v262_v38 = vpop.permute.xlu0 %261 }
  0xcb   :  { %v292_v62 = vpop.permute.xlu1 %291 }
  0xcc   :  { %v341_v63 = vadd.f32 %v292_v62, %v229_v61  ;;  %v339_v12 = vadd.f32 %v282_v9, %v227_v7 }
  0xce   :  { %v357_v1 = vmax.f32 %v341_v63, 0.0  ;;  %v355_v15 = vmax.f32 %v339_v12, 0.0 }
  0xd0   :  { %v156_v5 = vpop.permute.xlu1 %155  ;;  %513 = vmatpush3.msra.mxu0 %v357_v1 }
  0xd1   :  { %514 = vmatprep.subr.mxu0 %v583_v16  ;;  %v210_v47 = vmul.f32 %v749_v54, %v156_v5 }
  0xd3   :  { %v226_v18 = vadd.f32 %v210_v47, %v126_v44 }
  0xd5   :  { %v287_v10 = vpop.permute.xlu1 %286 }
  0xd6   :  { %v340_v11 = vadd.f32 %v287_v10, %v228_v8 }
  0xd8   :  { %v356_v13 = vmax.f32 %v340_v11, 0.0 }
  0xda   :  { %v152_v14 = vpop.permute.xlu1 %151  ;;  %515 = vmatpush3.msra.mxu0 %v356_v13 }
  0xdb   :  { %516 = vmatprep.subr.mxu0 %v583_v16  ;;  %v209_v21 = vmul.f32 %v749_v54, %v152_v14 }
  0xdc   :  { %517 = vmatpush3.msra.mxu0 %v355_v15 }
  0xdd   :  { %518 = vmatprep.subr.mxu0 %v583_v16  ;;  %v225_v25 = vadd.f32 %v209_v21, %v125_v24 }
  0xdf   :  { %v51_v17 = vpop.permute.xlu1 %50 }
  0xe0   :  { %v124_v32 = vmul.f32 %v753_v57, %v51_v17 }
  0xe2   :  { %v224_v37 = vadd.f32 %v208_v34, %v124_v32 }
  0xe3   :  { %v277_v19 = vpop.permute.xlu1 %276 }
  0xe4   :  { %v338_v20 = vadd.f32 %v277_v19, %v226_v18 }
  0xe6   :  { %v354_v22 = vmax.f32 %v338_v20, 0.0 }
  0xe7   :  { %v46_v23 = vpop.permute.xlu1 %45 }
  0xe8   :  { %519 = vmatpush3.msra.mxu0 %v354_v22  ;;  %v123_v28 = vmul.f32 %v753_v57, %v46_v23 }
  0xe9   :  { %520 = vmatprep.subr.mxu0 %v583_v16 }
  0xea   :  { %v223_v35 = vadd.f32 %v207_v31, %v123_v28 }
  0xeb   :  { %v272_v26 = vpop.permute.xlu1 %271 }
  0xec   :  { %v337_v27 = vadd.f32 %v272_v26, %v225_v25  ;;  %v335_v43 = vadd.f32 %v262_v38, %v223_v35 }
  0xee   :  { %v353_v29 = vmax.f32 %v337_v27, 0.0  ;;  %v351_v48 = vmax.f32 %v335_v43, 0.0 }
  0xf0   :  { %v140_v33 = vpop.permute.xlu1 %139  ;;  %521 = vmatpush3.msra.mxu0 %v353_v29 }
  0xf1   :  { %522 = vmatprep.subr.mxu0 %v583_v16  ;;  %v206_v36 = vmul.f32 %v749_v54, %v140_v33  ;;  %v371_v54 = vpop.permute.xlu0 %370 }
  0xf3   :  { %v222_v45 = vadd.f32 %v206_v36, %v122_v40 }
  0xf5   :  { %v267_v39 = vpop.permute.xlu1 %266 }
  0xf6   :  { %v336_v41 = vadd.f32 %v267_v39, %v224_v37 }
  0xf8   :  { %v352_v55 = vmax.f32 %v336_v41, 0.0 }
  0xf9   :  { %v257_v42 = vpop.permute.xlu1 %256 }
  0xfa   :  { %v334_v46 = vadd.f32 %v257_v42, %v222_v45  ;;  %523 = vmatpush3.msra.mxu0 %v352_v55 }
  0xfb   :  { %524 = vmatprep.subr.mxu0 %v583_v16 }
  0xfc   :  { %v350_v49 = vmax.f32 %v334_v46, 0.0  ;;  %525 = vmatpush3.msra.mxu0 %v351_v48 }
  0xfd   :  { %526 = vmatprep.subr.mxu0 %v583_v16 }
  0xfe   :  { %527 = vmatpush3.msra.mxu0 %v350_v49 }
  0xff   :  { %529 = vmatmul.mubr.f32.vlgmr.msra.gmra.mxu0 %v366_v51 }
 0x1bf   :  { %v439_v57 = vpop.f32.mrf.mxu0 }
 0x1c0   :  { %v440_v50 = vadd.f32 %v439_v57, %v371_v54 }
 0x1c1   :  { %v530_v52 = vpop.f32.mrf.mxu0 }
 0x1c2   :  { %v443_v53 = vand.u32 2147483647, %v440_v50  ;;  %vm451_vm1 = vcmp.ge.f32.partialorder %v440_v50, 0.0  ;;  %v458_v0 = vrot.slane %v440_v50, 7 }
 0x1c4   :  { %v444_v56 = vsub.f32 0.0, %v443_v53 }
 0x1c6   :  { %v445_v58 = vmul.f32 1.442695, %v444_v56 }
 0x1c8   :  { %555 = vpow2.f32 %v445_v58 }
 0x1d5   :  { %v556_v59 = vpop.eup %555 }
 0x1d6   :  { %v447_v60 = vadd.f32 1.0, %v556_v59 }
 0x1d8   :  { %557 = vrcp.f32 %v447_v60 }
 0x1e5   :  { %v558_v61 = vpop.eup %557 }
 0x1e6   :  { %v450_v62 = vmul.f32 %v558_v61, %v556_v59 }
 0x1e8   :  { %v452_v63 = vsel %vm451_vm1, %v558_v61, %v450_v62  ;;  %v453_v1 = vsel %vm451_vm1, %v450_v62, %v558_v61 }
 0x1e9   :  { %v455_v16 = vrot.slane %v452_v63, 7 }
 0x1eb   :  { %v461_v2 = vsel %vm460_vm2, %v453_v1, %v455_v16 }
 0x1ec   :  { %v463_v3 = vsel %vm462_vm3, %v461_v2, %v458_v0 }
 0x1ed   :  { %464 = vst [vmem:[#allocation2] sm:$0x7] %v463_v3 }
 0x1ee   :  { %570 = shalt.err (!%p567_p4)
}
 0x1ef   :  { %474 = dma.vmem_to_hbm [thread:$0]  %s472_s9, 64, %s817_s5, [#allocation3]  }
 0x1f0   :  { %579 = dma.done.wait [#allocation3], 64  }
 0x1f1   :  { %580 = vsyncadd [#allocation3], 4294967232 }
 0x1f2   :  { %478 = vsyncpa [#allocation3], 1 }

</bundles_post_ra>
